<compile_context>
chip_gen: v7x
topology: tpu7x:2x2x1
jax: 0.10.0
libtpu: 0.0.40
codegen_flags: <defaults>
</compile_context>

<pallas_src>
import jax
import jax.numpy as jnp
from jax import lax
from jax.experimental import pallas as pl
from jax.experimental.pallas import tpu as pltpu

_LANE = 128
_STREAM_BUFFERS = 2                      # double-buffer streamed frame/wf blocks (v7x-safe)
_FAST_PATH_BYTES = 8 * 1024 * 1024       # resident-footprint threshold for the un-gridded path


def _cdiv(a, b):
    return (a + b - 1) // b


def _round_up(x, m):
    return _cdiv(x, m) * m


def _vmem_capacity_bytes():
    try:
        return int(pltpu.get_tpu_info().vmem_capacity_bytes)
    except Exception:
        return 64 * 1024 * 1024          # conservative v7x floor if the query is unavailable


def _frame_dot(frame_bf16, wf_blk, wf_transposed):
    """Partial contraction of a frame block with a wf block (f32 MXU accumulation)."""
    if wf_transposed:
        # wf stored lane-dense as [D, Df]; contract the last dims of both (NT matmul).
        return lax.dot_general(frame_bf16, wf_blk, (((1,), (1,)), ((), ())),
                               preferred_element_type=jnp.float32)
    return jnp.dot(frame_bf16, wf_blk, preferred_element_type=jnp.float32)


def _head(fs_pre, ff_acc, wc, bc, out_dtype):
    """relu(sound) * sigmoid(frame) -> classifier linear head (bf16 operands, f32 acc)."""
    fs = jnp.maximum(fs_pre, 0.0)        # sound_activation = relu
    ff = jax.nn.sigmoid(ff_acc)          # img_activation   = sigmoid
    fused = (fs * ff).astype(wc.dtype)
    return (jnp.dot(fused, wc, preferred_element_type=jnp.float32) + bc).astype(out_dtype)


# ----------------------------------------------------------------------------- kernels


def make_fast_kernel(wf_transposed):
    """Everything resident in VMEM, no grid: for small problems."""
    def kernel(audio_ref, frame_ref, ws_ref, bs_ref, wf_ref, bf_ref, wc_ref, bc_ref, out_ref):
        bf16 = jnp.bfloat16
        fs_pre = jnp.dot(audio_ref[...].astype(bf16), ws_ref[...],
                         preferred_element_type=jnp.float32) + bs_ref[...]
        ff_acc = _frame_dot(frame_ref[...].astype(bf16), wf_ref[...], wf_transposed) \
            + bf_ref[...]
        out_ref[...] = _head(fs_pre, ff_acc, wc_ref[...], bc_ref[...], out_ref.dtype)
    return kernel


def make_stream_kernel(wf_transposed):
    """Grid = (batch_tiles, Df_tiles); Df contraction is the trailing ('arbitrary') axis."""
    def kernel(audio_ref, frame_ref, ws_ref, bs_ref, wf_ref, bf_ref, wc_ref, bc_ref,
               out_ref, acc_ref):
        k = pl.program_id(1)

        @pl.when(k == 0)
        def _():
            # Fold the frame bias into the accumulator init (no per-chunk re-broadcast).
            acc_ref[...] = jnp.broadcast_to(bf_ref[...], acc_ref.shape)

        # bf16 cast happens in-kernel (hides under the DMA); no padded bf16 copy in HBM.
        acc_ref[...] += _frame_dot(frame_ref[...].astype(jnp.bfloat16), wf_ref[...],
                                   wf_transposed)

        @pl.when(k == pl.num_programs(1) - 1)
        def _():
            fs_pre = jnp.dot(audio_ref[...].astype(jnp.bfloat16), ws_ref[...],
                             preferred_element_type=jnp.float32) + bs_ref[...]
            out_ref[...] = _head(fs_pre, acc_ref[...], wc_ref[...], bc_ref[...], out_ref.dtype)
    return kernel


# ------------------------------------------------------------------- one-time weight prep


def _choose_tile_df(Df, max_tile):
    """Largest multiple-of-128 tile that divides the (minimally padded) Df."""
    max_tile = max(_LANE, (max_tile // _LANE) * _LANE)
    Df_pad = Df if Df % _LANE == 0 else _round_up(Df, _LANE)
    best = _LANE
    d = _LANE
    limit = min(Df_pad, max_tile)
    while d <= limit:
        if Df_pad % d == 0:
            best = d
        d += _LANE
    return best, Df_pad


def prepare_params(params, *, tile_b=None, max_tile_df=None):
    """One-time weight cast / pad / layout, hoisted out of the per-call forward path."""
    ws, bs, wf, bf, wc, bc = params
    Da, D = ws.shape
    Df = wf.shape[0]
    K = wc.shape[1]
    K_pad = _round_up(K, _LANE)
    bf16 = jnp.bfloat16

    capacity = _vmem_capacity_bytes()
    if tile_b is None:
        # 256-row batch tiles when 128 MiB VMEM (v5e/v6e), 128 on 64 MiB (v7x).
        tile_b = 256 if capacity >= 96 * 1024 * 1024 else 128

    # VMEM budget for the streamed (frame f32 + wf bf16) buffers -> tile_df.
    budget = int(capacity * 0.55)
    fixed = (2 * tile_b * Da * 4                # audio block (f32, double-buffered)
             + 2 * (Da * D + D * K_pad) * 2     # ws / wc resident (bf16, worst case 2 bufs)
             + 2 * (2 * D + K_pad) * 4          # biases
             + 2 * tile_b * K_pad * 4           # output block (f32, double-buffered)
             + tile_b * D * 4)                  # f32 accumulator scratch
    per_df_col = _STREAM_BUFFERS * (tile_b * 4 + D * 2)
    tile_df_max = max(_LANE, (budget - fixed) // per_df_col)
    tile_df_max = min(tile_df_max, 8192)
    if max_tile_df is not None:
        tile_df_max = max(_LANE, min(tile_df_max, max_tile_df))
    tile_df, Df_pad = _choose_tile_df(Df, tile_df_max)

    wf_transposed = D < _LANE                   # lane-dense wf blocks when D would waste lanes
    wf_p = wf.astype(bf16)
    if Df_pad != Df:
        wf_p = jnp.zeros((Df_pad, D), bf16).at[:Df].set(wf_p)
    if wf_transposed:
        wf_p = wf_p.T                           # [D, Df_pad]

    vmem_limit = fixed + per_df_col * tile_df + (4 << 20)
    vmem_limit = min(max(vmem_limit, 32 << 20), int(capacity * 0.75))

    return dict(
        ws=ws.astype(bf16),
        bs=bs.astype(jnp.float32).reshape(1, D),
        wf=wf_p,
        bf=bf.astype(jnp.float32).reshape(1, D),
        wc=jnp.zeros((D, K_pad), bf16).at[:, :K].set(wc.astype(bf16)),
        bc=jnp.zeros((1, K_pad), jnp.float32).at[:, :K].set(bc.astype(jnp.float32)),
        Da=Da, D=D, Df=Df, Df_pad=Df_pad, K=K, K_pad=K_pad,
        tile_b=tile_b, tile_df=tile_df, wf_transposed=wf_transposed,
        vmem_limit_bytes=int(vmem_limit),
    )


# ----------------------------------------------------------------------------- forward


def _forward_fast(audio, frame_flat, weights, p):
    B = audio.shape[0]
    Da, D, Df, Df_pad = p["Da"], p["D"], p["Df"], p["Df_pad"]
    K, K_pad = p["K"], p["K_pad"]
    B_pad = _round_up(B, 8)
    if B_pad != B:
        audio = jnp.pad(audio, ((0, B_pad - B), (0, 0)))
    if B_pad != B or Df_pad != Df:
        frame_flat = jnp.pad(frame_flat, ((0, B_pad - B), (0, Df_pad - Df)))

    flops = 2 * B_pad * D * (Da + Df_pad + K_pad)
    bytes_accessed = (B_pad * (Da + Df_pad) * 4 + Df_pad * D * 2
                      + (Da * D + D * K_pad) * 2 + (2 * D + K_pad) * 4
                      + B_pad * K_pad * 4)

    out = pl.pallas_call(
        make_fast_kernel(p["wf_transposed"]),
        out_shape=jax.ShapeDtypeStruct((B_pad, K_pad), jnp.float32),
        cost_estimate=pl.CostEstimate(flops=int(flops),
                                      transcendentals=int(B_pad * D),
                                      bytes_accessed=int(bytes_accessed)),
    )(audio, frame_flat, *weights)
    return out[:B, :K]


def _forward_stream(audio, frame_flat, weights, p):
    B = audio.shape[0]
    Da, D, Df, Df_pad = p["Da"], p["D"], p["Df"], p["Df_pad"]
    K, K_pad = p["K"], p["K_pad"]
    tile_df = p["tile_df"]
    wf_transposed = p["wf_transposed"]

    # Large batch tiles keep the MXU full and minimise wf re-streaming; but guarantee >= 2
    # batch tiles when B allows so the "parallel" axis shards across v7x's two TensorCores.
    tile_b = min(p["tile_b"], _round_up(B, 16))
    nb = _cdiv(B, tile_b)
    if nb < 2 and tile_b >= 64:
        tile_b = max(32, _round_up(_cdiv(B, 2), 16))
        nb = _cdiv(B, tile_b)
    B_pad = nb * tile_b
    nk = Df_pad // tile_df

    if B_pad != B:
        audio = jnp.pad(audio, ((0, B_pad - B), (0, 0)))
    if B_pad != B or Df_pad != Df:
        # TODO(synk): a masked remainder chunk would avoid this per-call pad when Df % 128 != 0.
        frame_flat = jnp.pad(frame_flat, ((0, B_pad - B), (0, Df_pad - Df)))

    ws, bs, wf, bf, wc, bc = weights
    stream = pl.Buffered(_STREAM_BUFFERS)
    if wf_transposed:
        wf_spec = pl.BlockSpec((D, tile_df), lambda b, k: (0, k), pipeline_mode=stream)
    else:
        wf_spec = pl.BlockSpec((tile_df, D), lambda b, k: (k, 0), pipeline_mode=stream)

    grid_spec = pltpu.PrefetchScalarGridSpec(
        num_scalar_prefetch=0,
        grid=(nb, nk),
        in_specs=[
            pl.BlockSpec((tile_b, Da), lambda b, k: (b, 0)),                  # audio (f32)
            pl.BlockSpec((tile_b, tile_df), lambda b, k: (b, k),
                         pipeline_mode=stream),                               # frame chunks (f32)
            pl.BlockSpec((Da, D), lambda b, k: (0, 0)),                       # ws (resident)
            pl.BlockSpec((1, D), lambda b, k: (0, 0)),                        # bs
            wf_spec,                                                          # wf chunks (streamed)
            pl.BlockSpec((1, D), lambda b, k: (0, 0)),                        # bf
            pl.BlockSpec((D, K_pad), lambda b, k: (0, 0)),                    # wc (resident)
            pl.BlockSpec((1, K_pad), lambda b, k: (0, 0)),                    # bc
        ],
        out_specs=pl.BlockSpec((tile_b, K_pad), lambda b, k: (b, 0)),
        scratch_shapes=[pltpu.VMEM((tile_b, D), jnp.float32)],                # frame-linear acc
    )

    flops = 2 * B_pad * D * (Da + Df_pad + K_pad)
    bytes_accessed = (B_pad * (Da + Df_pad) * 4      # activations read once (f32)
                      + nb * Df_pad * D * 2          # wf re-streamed once per batch tile
                      + (Da * D + D * K_pad) * 2     # ws / wc
                      + (2 * D + K_pad) * 4          # biases
                      + B_pad * K_pad * 4)           # output write

    out = pl.pallas_call(
        make_stream_kernel(wf_transposed),
        out_shape=jax.ShapeDtypeStruct((B_pad, K_pad), jnp.float32),
        grid_spec=grid_spec,
        compiler_params=pltpu.CompilerParams(
            dimension_semantics=("parallel", "arbitrary"),
            vmem_limit_bytes=int(p["vmem_limit_bytes"]),
        ),
        cost_estimate=pl.CostEstimate(flops=int(flops),
                                      transcendentals=int(B_pad * D),
                                      bytes_accessed=int(bytes_accessed)),
    )(audio, frame_flat, ws, bs, wf, bf, wc, bc)
    return out[:B, :K]


def netwrapper_forward(audio, frame, prepared, *, path="auto"):
    """audio: [B, Da] f32; frame: [B, C, H, W] f32 (NCHW). Returns [B, K] f32 logits."""
    B = audio.shape[0]
    frame_flat = frame.reshape(B, -1)    # matches torch .view on a contiguous NCHW tensor
    assert frame_flat.shape[1] == prepared["Df"] and audio.shape[1] == prepared["Da"]

    weights = (prepared["ws"], prepared["bs"], prepared["wf"], prepared["bf"],
               prepared["wc"], prepared["bc"])

    if path == "auto":
        resident = (B * (prepared["Da"] + prepared["Df_pad"] + prepared["K_pad"]
                         + 4 * prepared["D"]) * 4
                    + prepared["Df_pad"] * prepared["D"] * 2
                    + (prepared["Da"] * prepared["D"]
                       + prepared["D"] * prepared["K_pad"]) * 2)
        path = "fast" if resident <= _FAST_PATH_BYTES else "stream"

    if path == "fast":
        return _forward_fast(audio, frame_flat, weights, prepared)
    return _forward_stream(audio, frame_flat, weights, prepared)


# ----------------------------------------------------------------------------- demo / test


def init_params(key, da, df, d, k):
    ks = jax.random.split(key, 6)
    ws = jax.random.normal(ks[0], (da, d), jnp.float32) * 0.1
    bs = jax.random.normal(ks[1], (1, d), jnp.float32) * 0.01
    wf = jax.random.normal(ks[2], (df, d), jnp.float32) * 0.02
    bf = jax.random.normal(ks[3], (1, d), jnp.float32) * 0.01
    wc = jax.random.normal(ks[4], (d, k), jnp.float32) * 0.1
    bc = jax.random.normal(ks[5], (1, k), jnp.float32) * 0.01
    return ws, bs, wf, bf, wc, bc


def reference_forward(audio, frame, params):
    """Pure-JAX reference with the same bf16 operand casts (f32 MXU accumulation)."""
    ws, bs, wf, bf, wc, bc = params
    b16 = jnp.bfloat16
    B = audio.shape[0]
    fs = jnp.maximum(
        jnp.dot(audio.astype(b16), ws.astype(b16),
                preferred_element_type=jnp.float32) + bs.reshape(1, -1), 0.0)
    ff = jax.nn.sigmoid(
        jnp.dot(frame.reshape(B, -1).astype(b16), wf.astype(b16),
                preferred_element_type=jnp.float32) + bf.reshape(1, -1))
    return jnp.dot((fs * ff).astype(b16), wc.astype(b16),
                   preferred_element_type=jnp.float32) + bc.reshape(1, -1)


def _run_case(key, *, B, C, H, W, Da, D, K, path, tile_b=None, max_tile_df=None):
    ka, kf, kp = jax.random.split(key, 3)
    audio = jax.random.normal(ka, (B, Da), jnp.float32)
    frame = jax.random.normal(kf, (B, C, H, W), jnp.float32)
    params = init_params(kp, Da, C * H * W, D, K)
    prepared = prepare_params(params, tile_b=tile_b, max_tile_df=max_tile_df)
    pred = jax.block_until_ready(netwrapper_forward(audio, frame, prepared, path=path))
    ref = reference_forward(audio, frame, params)
    assert pred.shape == (B, K)
    err = float(jnp.max(jnp.abs(pred - ref)))
    assert jnp.allclose(pred, ref, atol=2e-2, rtol=2e-2), err


if __name__ == "__main__":
    key = jax.random.PRNGKey(0)
    k0, k1, k2 = jax.random.split(key, 3)

    # A: tiny problem -> un-gridded resident fast path (wf stored transposed since D < 128).
    _run_case(k0, B=2, C=4, H=16, W=16, Da=32, D=32, K=8, path="auto")
    # B: streamed 2-D grid path with lane-dense transposed wf blocks (D < 128), nb=3, nk=4.
    _run_case(k1, B=48, C=8, H=16, W=16, Da=64, D=64, K=24, path="stream",
              tile_b=16, max_tile_df=512)
    # C: streamed 2-D grid path with standard [tile_df, D] wf blocks (D >= 128) + batch pad.
    _run_case(k2, B=40, C=4, H=16, W=16, Da=32, D=256, K=40, path="stream",
              tile_b=16, max_tile_df=256)

    # TODO(synk): net_sound / net_frame / net_classifier architectures are not defined in the
    # source module; linear projections + elementwise-product classifier stand in for them.
    print("KERNEL_OK")
</pallas_src>

<mosaic_0001>
module attributes {stable_mosaic.version = 11 : i64} {
  func.func @kernel(%arg0: memref<8x32xf32, #tpu.memory_space<vmem>>, %arg1: memref<8x1024xf32, #tpu.memory_space<vmem>>, %arg2: memref<32x32xbf16, #tpu.memory_space<vmem>>, %arg3: memref<1x32xf32, #tpu.memory_space<vmem>>, %arg4: memref<32x1024xbf16, #tpu.memory_space<vmem>>, %arg5: memref<1x32xf32, #tpu.memory_space<vmem>>, %arg6: memref<32x128xbf16, #tpu.memory_space<vmem>>, %arg7: memref<1x128xf32, #tpu.memory_space<vmem>>, %arg8: memref<8x128xf32, #tpu.memory_space<vmem>>) attributes {dimension_semantics = [], scalar_prefetch = 0 : i64, scratch_operands = 0 : i64, tpu.core_type = #tpu.core_type<tc>} {
    %c0 = arith.constant 0 : index
    %c0_0 = arith.constant 0 : index
    %0 = vector.load %arg0[%c0, %c0_0] : memref<8x32xf32, #tpu.memory_space<vmem>>, vector<8x32xf32>
    %1 = arith.truncf %0 : vector<8x32xf32> to vector<8x32xbf16>
    %c0_1 = arith.constant 0 : index
    %c0_2 = arith.constant 0 : index
    %2 = vector.load %arg2[%c0_1, %c0_2] : memref<32x32xbf16, #tpu.memory_space<vmem>>, vector<32x32xbf16>
    %cst = arith.constant dense<0.000000e+00> : vector<8x32xf32>
    %3 = tpu.matmul %1, %2, %cst {dimension_numbers = #tpu.dot_dimension_numbers<[1], [0], [0], [1], [0, 0, 1, 1], [], []>} : vector<8x32xbf16>, vector<32x32xbf16>, vector<8x32xf32> -> vector<8x32xf32>
    %c0_3 = arith.constant 0 : index
    %c0_4 = arith.constant 0 : index
    %4 = vector.load %arg3[%c0_3, %c0_4] : memref<1x32xf32, #tpu.memory_space<vmem>>, vector<1x32xf32>
    %5 = vector.broadcast %4 : vector<1x32xf32> to vector<8x32xf32>
    %6 = arith.addf %3, %5 : vector<8x32xf32>
    %c0_5 = arith.constant 0 : index
    %c0_6 = arith.constant 0 : index
    %7 = vector.load %arg1[%c0_5, %c0_6] : memref<8x1024xf32, #tpu.memory_space<vmem>>, vector<8x1024xf32>
    %8 = arith.truncf %7 : vector<8x1024xf32> to vector<8x1024xbf16>
    %c0_7 = arith.constant 0 : index
    %c0_8 = arith.constant 0 : index
    %9 = vector.load %arg4[%c0_7, %c0_8] : memref<32x1024xbf16, #tpu.memory_space<vmem>>, vector<32x1024xbf16>
    %cst_9 = arith.constant dense<0.000000e+00> : vector<8x32xf32>
    %10 = tpu.matmul %8, %9, %cst_9 {dimension_numbers = #tpu.dot_dimension_numbers<[1], [1], [0], [0], [0, 0, 1, 0], [], []>} : vector<8x1024xbf16>, vector<32x1024xbf16>, vector<8x32xf32> -> vector<8x32xf32>
    %c0_10 = arith.constant 0 : index
    %c0_11 = arith.constant 0 : index
    %11 = vector.load %arg5[%c0_10, %c0_11] : memref<1x32xf32, #tpu.memory_space<vmem>>, vector<1x32xf32>
    %12 = vector.broadcast %11 : vector<1x32xf32> to vector<8x32xf32>
    %13 = arith.addf %10, %12 : vector<8x32xf32>
    %c0_12 = arith.constant 0 : index
    %c0_13 = arith.constant 0 : index
    %14 = vector.load %arg6[%c0_12, %c0_13] : memref<32x128xbf16, #tpu.memory_space<vmem>>, vector<32x128xbf16>
    %c0_14 = arith.constant 0 : index
    %c0_15 = arith.constant 0 : index
    %15 = vector.load %arg7[%c0_14, %c0_15] : memref<1x128xf32, #tpu.memory_space<vmem>>, vector<1x128xf32>
    %cst_16 = arith.constant 0.000000e+00 : f32
    %16 = vector.broadcast %cst_16 : f32 to vector<8x32xf32>
    %17 = arith.maximumf %6, %16 : vector<8x32xf32>
    %18 = arith.negf %13 : vector<8x32xf32>
    %19 = math.exp %18 : vector<8x32xf32>
    %cst_17 = arith.constant 1.000000e+00 : f32
    %20 = vector.broadcast %cst_17 : f32 to vector<8x32xf32>
    %21 = arith.addf %20, %19 : vector<8x32xf32>
    %22 = arith.divf %20, %21 : vector<8x32xf32>
    %23 = arith.mulf %17, %22 : vector<8x32xf32>
    %24 = arith.truncf %23 : vector<8x32xf32> to vector<8x32xbf16>
    %cst_18 = arith.constant dense<0.000000e+00> : vector<8x128xf32>
    %25 = tpu.matmul %24, %14, %cst_18 {dimension_numbers = #tpu.dot_dimension_numbers<[1], [0], [0], [1], [0, 0, 1, 1], [], []>} : vector<8x32xbf16>, vector<32x128xbf16>, vector<8x128xf32> -> vector<8x128xf32>
    %26 = vector.broadcast %15 : vector<1x128xf32> to vector<8x128xf32>
    %27 = arith.addf %25, %26 : vector<8x128xf32>
    %c0_19 = arith.constant 0 : index
    %c0_20 = arith.constant 0 : index
    %28 = vector.load %arg8[%c0_19, %c0_20] : memref<8x128xf32, #tpu.memory_space<vmem>>, vector<8x128xf32>
    tpu.vector_store %arg8[%c0_19, %c0_20], %27 {strides = array<i32>} : memref<8x128xf32, #tpu.memory_space<vmem>>, vector<8x128xf32>,
    return
  }
}

</mosaic_0001>

<bundles_post_ra>
// kernel: tpu_custom_call.1
= control target key start
LH: loop header
LB: loop body
LE: loop exit
PB: predicated region body
PF: predicated region fallthrough
CT: control target
= control target key end

     0   :  { %13 = vsyncpa [#allocation3], 0  ;;  %s859_s0 = inlined_call_operand.hbm [shape: f32[8,32], index: 0, kind: input, shape index: {}]   ;;  %s860_s1 = inlined_call_operand.hbm [shape: f32[8,1024], index: 1, kind: input, shape index: {}]   ;;  %s861_s2 = inlined_call_operand.hbm [shape: bf16[32,32], index: 2, kind: input, shape index: {}]   ;;  %s862_s3 = inlined_call_operand.vmem [shape: f32[1,32], index: 3, kind: input, shape index: {}]   ;;  %s863_s4 = inlined_call_operand.hbm [shape: bf16[32,1024], index: 4, kind: input, shape index: {}]   ;;  %s864_s5 = inlined_call_operand.vmem [shape: f32[1,32], index: 5, kind: input, shape index: {}]   ;;  %s865_s6 = inlined_call_operand.vmem [shape: bf16[32,128], index: 6, kind: input, shape index: {}]   ;;  %s866_s7 = inlined_call_operand.vmem [shape: f32[1,128], index: 7, kind: input, shape index: {}]   ;;  %s867_s8 = inlined_call_operand.hbm [shape: f32[8,128], index: 8, kind: output, shape index: {}]  }
   0x1   :  { %14 = vsyncpa [#allocation6], 0 }
   0x2   :  { %15 = vsyncpa [#allocation9], 0 }
   0x3   :  { %16 = vsyncpa [#allocation4], 0  ;;  %s718_s27 = smov [#allocation5]   ;;  %s719_s29 = smov [#allocation2]  }
   0x4   :  { %s33_s28 = sshll.u32 %s718_s27, 4  ;;  %s23_s30 = sshll.u32 %s719_s29, 4  ;;  %s34_s28 = int_to_ptr.vmem [resolvable:$true] %s33_s28  ;;  %s24_s30 = int_to_ptr.vmem [resolvable:$true] %s23_s30 }
   0x5   :  { %s600_s11 = scalar_lea.hbm %s860_s1, 1024 }
   0x6   :  { %p601_p0 = scmp.ne.s32.totalorder %s860_s1, %s600_s11  ;;  %p604_p1 = scmp.lt.u32.totalorder %s600_s11, %s860_s1 }
   0x8   :  { %p606_p2 = pnand %p604_p1, %p601_p0 }
   0xa   :  { %609 = shalt.err (!%p606_p2)
}
   0xb   :  { %s610_s16 = scalar_lea.vmem %s34_s28, 1024  ;;  %p615_p4 = scmp.lt.s32.totalorder %s34_s28, %s34_s28 }
   0xc   :  { %p611_p3 = scmp.ne.s32.totalorder %s34_s28, %s610_s16  ;;  %p616_p5 = scmp.lt.s32.totalorder %s610_s16, %s610_s16 }
   0xe   :  { %p617_p6 = por %p616_p5, %p615_p4 }
  0x10   :  { %p618_p7 = pnand %p617_p6, %p611_p3 }
  0x12   :  { %621 = shalt.err (!%p618_p7)
}
  0x13   :  { %36 = dma.hbm_to_vmem [thread:$0]  %s860_s1, 1024, %s34_s28, [#allocation6]  }
  0x14   :  { %s622_s21 = scalar_lea.hbm %s859_s0, 128 }
  0x15   :  { %p623_p8 = scmp.ne.s32.totalorder %s859_s0, %s622_s21  ;;  %p626_p9 = scmp.lt.u32.totalorder %s622_s21, %s859_s0 }
  0x17   :  { %p628_p10 = pnand %p626_p9, %p623_p8 }
  0x19   :  { %631 = shalt.err (!%p628_p10)
}
  0x1a   :  { %s632_s26 = scalar_lea.vmem %s24_s30, 128  ;;  %p637_p12 = scmp.lt.s32.totalorder %s24_s30, %s24_s30 }
  0x1b   :  { %p633_p11 = scmp.ne.s32.totalorder %s24_s30, %s632_s26  ;;  %p638_p13 = scmp.lt.s32.totalorder %s632_s26, %s632_s26 }
  0x1d   :  { %p639_p0 = por %p638_p13, %p637_p12 }
  0x1f   :  { %p640_p1 = pnand %p639_p0, %p633_p11 }
  0x21   :  { %643 = shalt.err (!%p640_p1)
}
  0x22   :  { %26 = dma.hbm_to_vmem [thread:$0]  %s859_s0, 128, %s24_s30, [#allocation3]  }
  0x23   :  { %s720_s28 = smov [#allocation7]   ;;  %s644_s11 = scalar_lea.hbm %s861_s2, 256 }
  0x24   :  { %s42_s29 = sshll.u32 %s720_s28, 4  ;;  %p645_p2 = scmp.ne.s32.totalorder %s861_s2, %s644_s11  ;;  %s43_s29 = int_to_ptr.vmem [resolvable:$true] %s42_s29 }
  0x25   :  { %p648_p3 = scmp.lt.u32.totalorder %s644_s11, %s861_s2 }
  0x27   :  { %p650_p4 = pnand %p648_p3, %p645_p2 }
  0x29   :  { %653 = shalt.err (!%p650_p4)
}
  0x2a   :  { %s654_s16 = scalar_lea.vmem %s43_s29, 256  ;;  %p659_p6 = scmp.lt.s32.totalorder %s43_s29, %s43_s29 }
  0x2b   :  { %p655_p5 = scmp.ne.s32.totalorder %s43_s29, %s654_s16  ;;  %p660_p7 = scmp.lt.s32.totalorder %s654_s16, %s654_s16 }
  0x2d   :  { %p661_p8 = por %p660_p7, %p659_p6 }
  0x2f   :  { %p662_p9 = pnand %p661_p8, %p655_p5 }
  0x31   :  { %665 = shalt.err (!%p662_p9)
}
  0x32   :  { %s721_s0 = smov 64   ;;  %s722_s30 = smov 4  }
  0x33   :  { %48 = dma.hbm_to_vmem [thread:$0]  %s861_s2, 256, %s43_s29, [#allocation6], %s721_s0, %s721_s0, %s722_s30  }
  0x34   :  { %s723_s19 = smov [#allocation8]   ;;  %s666_s23 = scalar_lea.hbm %s863_s4, 2048 }
  0x35   :  { %s56_s20 = sshll.u32 %s723_s19, 4  ;;  %p667_p10 = scmp.ne.s32.totalorder %s863_s4, %s666_s23  ;;  %s57_s20 = int_to_ptr.vmem [resolvable:$true] %s56_s20 }
  0x36   :  { %p670_p11 = scmp.lt.u32.totalorder %s666_s23, %s863_s4 }
  0x38   :  { %p672_p12 = pnand %p670_p11, %p667_p10 }
  0x3a   :  { %675 = shalt.err (!%p672_p12)
}
  0x3b   :  { %s676_s27 = scalar_lea.vmem %s57_s20, 2048  ;;  %p681_p0 = scmp.lt.s32.totalorder %s57_s20, %s57_s20 }
  0x3c   :  { %p677_p13 = scmp.ne.s32.totalorder %s57_s20, %s676_s27  ;;  %p682_p1 = scmp.lt.s32.totalorder %s676_s27, %s676_s27 }
  0x3e   :  { %p683_p2 = por %p682_p1, %p681_p0 }
  0x40   :  { %p684_p3 = pnand %p683_p2, %p677_p13 }
  0x42   :  { %687 = shalt.err (!%p684_p3)
}
  0x43   :  { %s724_s2 = smov 512   ;;  %s725_s28 = smov 32  }
  0x44   :  { %62 = dma.hbm_to_vmem [thread:$0]  %s863_s4, 2048, %s57_s20, [#allocation9], %s724_s2, %s724_s2, %s725_s28  }
  0x45   :  { %710 = dma.done.wait [#allocation3], 128  }
  0x46   :  { %711 = vsyncadd [#allocation3], 4294967168 }
  0x47   :  { %712 = dma.done.wait [#allocation6], 1280  }
  0x48   :  { %713 = vsyncadd [#allocation6], 4294966016 }
  0x49   :  { %714 = dma.done.wait [#allocation9], 2048  }
  0x4a   :  { %715 = vsyncadd [#allocation9], 4294965248  ;;  %v726_v0 = vmov 0.0   ;;  %vm727_vm0 = vmmov 0   ;;  %v168_v1 = vld [vmem:[#allocation8 + $0x8] sm:$0xff]  ;;  %v592_v8 = vld [vmem:[#allocation7] sm:$0xff]  }
  0x4b   :  { %555 = vmatprep.subr.bf16.mxu0 %v726_v0  ;;  %559 = vmatprep.mubr.msk.bf16.mxu0 %vm727_vm0, %v726_v0  ;;  %v172_v2 = vld [vmem:[#allocation8 + $0x28] sm:$0xff]  ;;  %v593_v11 = vld [vmem:[#allocation7 + $0x8] sm:$0xff]   ;;  %v167_v12 = vld [vmem:[#allocation8] sm:$0xff]  ;;  %vm107_vm1 = vcmask 261120   ;;  %s728_s0 = smov [#allocation10]  }
  0x4c   :  { %v176_v3 = vld [vmem:[#allocation8 + $0x48] sm:$0xff]  ;;  %v531_v4 = vcombine.high %v168_v1, %v172_v2  ;;  %v530_v5 = vcombine.low %v168_v1, %v172_v2  ;;  %556 = vmatpush3.bf16.msra.mxu0 %v592_v8  ;;  %v171_v13 = vld [vmem:[#allocation8 + $0x20] sm:$0xff]  ;;  %v169_v14 = vld [vmem:[#allocation8 + $0x10] sm:$0xff]  ;;  %s512_s30 = sshll.u32 %s728_s0, 4  ;;  %s513_s30 = int_to_ptr.vmem [resolvable:$true] %s512_s30 }
  0x4d   :  { %v180_v6 = vld [vmem:[#allocation8 + $0x68] sm:$0xff]  ;;  %v173_v15 = vld [vmem:[#allocation8 + $0x30] sm:$0xff]  ;;  %557 = vmatprep.subr.bf16.mxu0 %v726_v0  ;;  %v529_v16 = vcombine.high %v167_v12, %v171_v13  ;;  %v152_v21 = vld [vmem:[#allocation5 + $0x8] sm:$0xff]  ;;  %v528_v26 = vcombine.low %v167_v12, %v171_v13  ;;  %p693_p5 = scmp.lt.s32.totalorder %s513_s30, %s513_s30 }
  0x4e   :  { %v539_v7 = vcombine.high %v176_v3, %v180_v6  ;;  %v154_v9 = vld [vmem:[#allocation5 + $0x18] sm:$0xff]  ;;  %310 = vmatprep.subr.bf16.mxu1 %v531_v4  ;;  %v538_v19 = vcombine.low %v176_v3, %v180_v6  ;;  %v533_v20 = vcombine.high %v169_v14, %v173_v15  ;;  %v175_v22 = vld [vmem:[#allocation8 + $0x40] sm:$0xff]  ;;  %v160_v24 = vpack.c.bf16 %v152_v21, %v152_v21  ;;  %v156_v27 = vld [vmem:[#allocation5 + $0x28] sm:$0xff] }
  0x4f   :  { %v162_v10 = vpack.c.bf16 %v154_v9, %v154_v9  ;;  %311 = vmatpush1.bf16.xpose.msra.mxu1 %v530_v5  ;;  %v82_v17 = vld [vmem:[#allocation2] sm:$0xff]  ;;  %v179_v23 = vld [vmem:[#allocation8 + $0x60] sm:$0xff]  ;;  %v177_v28 = vld [vmem:[#allocation8 + $0x50] sm:$0xff]  ;;  %v532_v32 = vcombine.low %v169_v14, %v173_v15  ;;  %v164_v33 = vpack.c.bf16 %v156_v27, %v156_v27 }
  0x50   :  { %312 = vmatprep.subr.bf16.mxu1 %v539_v7  ;;  %v83_v18 = vpack.c.bf16 %v82_v17, %v82_v17  ;;  %558 = vmatpush3.bf16.msra.mxu0 %v593_v11  ;;  %v153_v25 = vld [vmem:[#allocation5 + $0x10] sm:$0xff]  ;;  %v181_v29 = vld [vmem:[#allocation8 + $0x70] sm:$0xff]  ;;  %v537_v30 = vcombine.high %v175_v22, %v179_v23  ;;  %v536_v35 = vcombine.low %v175_v22, %v179_v23  ;;  %v170_v36 = vld [vmem:[#allocation8 + $0x18] sm:$0xff] }
  0x51   :  { %342 = vmatprep.mubr.bf16.mxu1 %v162_v10  ;;  %270 = vmatprep.subr.bf16.mxu0 %v529_v16  ;;  %v161_v31 = vpack.c.bf16 %v153_v25, %v153_v25  ;;  %v541_v34 = vcombine.high %v177_v28, %v181_v29  ;;  %v174_v37 = vld [vmem:[#allocation8 + $0x38] sm:$0xff]  ;;  %v540_v38 = vcombine.low %v177_v28, %v181_v29  ;;  %v151_v40 = vld [vmem:[#allocation5] sm:$0xff]  ;;  %v158_v43 = vld [vmem:[#allocation5 + $0x38] sm:$0xff] }
  0x52   :  { %v535_v39 = vcombine.high %v170_v36, %v174_v37  ;;  %v155_v41 = vld [vmem:[#allocation5 + $0x20] sm:$0xff]  ;;  %v159_v42 = vpack.c.bf16 %v151_v40, %v151_v40  ;;  %v178_v44 = vld [vmem:[#allocation8 + $0x58] sm:$0xff]  ;;  %v534_v47 = vcombine.low %v170_v36, %v174_v37  ;;  %v166_v48 = vpack.c.bf16 %v158_v43, %v158_v43  ;;  %v157_v51 = vld [vmem:[#allocation5 + $0x30] sm:$0xff] }
  0x53   :  { %560 = vmatmul.mubr.msk.bf16.vlgmr.msra.gmra.mrb[0].mxu0 %vm107_vm1, %v83_v18  ;;  %v182_v45 = vld [vmem:[#allocation8 + $0x78] sm:$0xff]  ;;  %v163_v46 = vpack.c.bf16 %v155_v41, %v155_v41  ;;  %v165_v52 = vpack.c.bf16 %v157_v51, %v157_v51  ;;  %v595_v54 = vld [vmem:[%s865_s6 + $0x8] sm:$0xff]  }
  0x54   :  { %302 = vmatprep.mubr.bf16.mxu0 %v160_v24  ;;  %v543_v49 = vcombine.high %v178_v44, %v182_v45  ;;  %v542_v50 = vcombine.low %v178_v44, %v182_v45  ;;  %v594_v53 = vld [vmem:[%s865_s6] sm:$0xff]  }
  0x55   :  { %v527_v63 = vld [vmem:[%s864_s5] ss:$0 sm:$0xff] }
  0x56   :  { %v523_v9 = vld [vmem:[%s862_s3] ss:$0 sm:$0xff]  ;;  %s688_s3 = scalar_lea.vmem %s513_s30, 128 }
  0x57   :  { %313 = vmatpush1.bf16.xpose.msra.mxu1 %v538_v19  ;;  %v545_v15 = vld [vmem:[%s866_s7] ss:$0 sm:$0xff]  ;;  %p689_p4 = scmp.ne.s32.totalorder %s513_s30, %s688_s3  ;;  %p694_p6 = scmp.lt.s32.totalorder %s688_s3, %s688_s3 }
  0x58   :  { %350 = vmatprep.subr.bf16.mxu1 %v533_v20 }
  0x59   :  { %271 = vmatpush1.bf16.xpose.msra.mxu0 %v528_v26  ;;  %p695_p7 = por %p694_p6, %p693_p5 }
  0x5a   :  { %272 = vmatprep.subr.bf16.mxu0 %v537_v30 }
  0x5b   :  { %p696_p8 = pnand %p695_p7, %p689_p4 }
  0x5e   :  { %343 = vmatmul.mubr.bf16.vlgmr.msra.gmra.mrb[0].mxu1 %v161_v31 }
  0x5f   :  { %351 = vmatpush1.bf16.xpose.msra.mxu1 %v532_v32  ;;  %382 = vmatprep.mubr.bf16.mxu1 %v164_v33 }
  0x60   :  { %352 = vmatprep.subr.bf16.mxu1 %v541_v34 }
  0x61   :  { %273 = vmatpush1.bf16.xpose.msra.mxu0 %v536_v35 }
  0x62   :  { %563 = vmatprep.subr.bf16.mxu0 %v726_v0 }
  0x67   :  { %353 = vmatpush1.bf16.xpose.msra.mxu1 %v540_v38 }
  0x68   :  { %390 = vmatprep.subr.bf16.mxu1 %v535_v39  ;;  %303 = vmatmul.mubr.bf16.vlgmr.msra.gmra.mrb[4].mxu0 %v159_v42 }
  0x69   :  { %567 = vmatprep.mubr.msk.bf16.mxu0 %vm727_vm0, %v726_v0  ;;  %564 = vmatpush3.bf16.msra.mxu0 %v594_v53 }
  0x6a   :  { %565 = vmatprep.subr.bf16.mxu0 %v726_v0 }
  0x6d   :  { %566 = vmatpush3.bf16.msra.mxu0 %v595_v54 }
  0x6e   :  { %383 = vmatmul.mubr.bf16.vlgmr.msra.gmra.mrb[0].mxu1 %v163_v46 }
  0x6f   :  { %391 = vmatpush1.bf16.xpose.msra.mxu1 %v534_v47  ;;  %422 = vmatprep.mubr.bf16.mxu1 %v166_v48 }
  0x70   :  { %392 = vmatprep.subr.bf16.mxu1 %v543_v49 }
  0x77   :  { %393 = vmatpush1.bf16.xpose.msra.mxu1 %v542_v50 }
  0x7e   :  { %423 = vmatmul.mubr.bf16.vlgmr.msra.gmra.mrb[0].mxu1 %v165_v52 }
 0x126   :  { %v145_v55 = vpop.f32.mrb[0].mxu0 }
 0x127   :  { %v561_v56 = vpop.f32.mrb[1].mxu0  ;;  %v146_v10 = vadd.f32 %v523_v9, %v145_v55 }
 0x128   :  { %v148_v57 = vpop.f32.mrb[2].mxu0 }
 0x129   :  { %v562_v58 = vpop.f32.mrb[3].mxu0  ;;  %v435_v11 = vmax.f32 %v146_v10, 0.0 }
 0x13b   :  { %v304_v59 = vpop.f32.mrb[4].mxu0 }
 0x13c   :  { %v306_v60 = vpop.f32.mrb[5].mxu0  ;;  %v305_v1 = vadd.f32 %v527_v63, %v304_v59 }
 0x13d   :  { %v307_v61 = vpop.f32.mrb[6].mxu0 }
 0x13e   :  { %v308_v62 = vpop.f32.mrb[7].mxu0 }
 0x151   :  { %v424_v2 = vpop.f32.mrb[0].mxu1 }
 0x152   :  { %v572_v3 = vadd.f32 %v424_v2, %v305_v1  ;;  %v426_v4 = vpop.f32.mrb[1].mxu1 }
 0x153   :  { %v427_v5 = vpop.f32.mrb[2].mxu1 }
 0x154   :  { %v544_v6 = vmul.f32 -1.442695, %v572_v3  ;;  %v428_v0 = vpop.f32.mrb[3].mxu1 }
 0x156   :  { %596 = vpow2.f32 %v544_v6 }
 0x160   :  { %v597_v7 = vpop.eup %596 }
 0x161   :  { %v439_v8 = vadd.f32 1.0, %v597_v7 }
 0x163   :  { %598 = vrcp.f32 %v439_v8 }
 0x16d   :  { %v599_v12 = vpop.eup %598 }
 0x16e   :  { %v442_v13 = vmul.f32 %v599_v12, %v435_v11 }
 0x170   :  { %v443_v14 = vpack.c.bf16 %v442_v13, %v442_v13 }
 0x172   :  { %568 = vmatmul.mubr.msk.bf16.vlgmr.msra.gmra.mrb[8].mxu0 %vm107_vm1, %v443_v14 }
 0x245   :  { %v499_v16 = vpop.f32.mrb[8].mxu0 }
 0x246   :  { %v500_v17 = vadd.f32 %v545_v15, %v499_v16  ;;  %v569_v18 = vpop.f32.mrb[9].mxu0 }
 0x247   :  { %v502_v19 = vpop.f32.mrb[10].mxu0 }
 0x248   :  { %505 = vst [vmem:[#allocation10] sm:$0xff] %v500_v17  ;;  %v570_v20 = vpop.f32.mrb[11].mxu0 }
 0x249   :  { %699 = shalt.err (!%p696_p8)
}
 0x24a   :  { %s700_s7 = scalar_lea.hbm %s867_s8, 128 }
 0x24b   :  { %p701_p9 = scmp.ne.s32.totalorder %s867_s8, %s700_s7  ;;  %p704_p10 = scmp.lt.u32.totalorder %s700_s7, %s867_s8 }
 0x24d   :  { %p706_p11 = pnand %p704_p10, %p701_p9 }
 0x24f   :  { %709 = shalt.err (!%p706_p11)
}
 0x250   :  { %515 = dma.vmem_to_hbm [thread:$0]  %s513_s30, 128, %s867_s8, [#allocation4]  }
 0x251   :  { %716 = dma.done.wait [#allocation4], 128  }
 0x252   :  { %717 = vsyncadd [#allocation4], 4294967168 }
 0x253   :  { %519 = vsyncpa [#allocation3], 1 }
 0x254   :  { %520 = vsyncpa [#allocation6], 1 }
 0x255   :  { %521 = vsyncpa [#allocation9], 1 }
 0x256   :  { %522 = vsyncpa [#allocation4], 1 }

</bundles_post_ra>
